<compile_context>
chip_gen: v6e
topology: v6e:2x2x1
jax: 0.10.0
libtpu: 0.0.40
codegen_flags: <defaults>
</compile_context>

<pallas_src>
import math

import jax
import jax.numpy as jnp
from jax.experimental import pallas as pl
from jax.experimental.pallas import tpu as pltpu


# ---------------------------------------------------------------------------
# Fused sin/cos with a single shared range reduction (f32, Cephes-style).
# ---------------------------------------------------------------------------
_TWO_OVER_PI = 0.63661977236758134308
# pi/2 split into short-mantissa pieces so k * piece is exact (Cody-Waite).
_PIO2_1 = 1.5703125
_PIO2_2 = 4.837512969970703125e-4
_PIO2_3 = 7.54978995489188216e-8
# Minimax coefficients on [-pi/4, pi/4] (Cephes single precision).
_SIN_C0 = -1.9515295891e-4
_SIN_C1 = 8.3321608736e-3
_SIN_C2 = -1.6666654611e-1
_COS_C0 = 2.443315711809948e-5
_COS_C1 = -1.388731625493765e-3
_COS_C2 = 4.166664568298827e-2


def _sincos_shared(f):
    """Return (sin(f), cos(f)) in f32, sharing one range reduction."""
    f = f.astype(jnp.float32)
    k = jnp.floor(f * jnp.float32(_TWO_OVER_PI) + 0.5)      # quadrant count
    r = f - k * jnp.float32(_PIO2_1)
    r = r - k * jnp.float32(_PIO2_2)
    r = r - k * jnp.float32(_PIO2_3)                         # r in ~[-pi/4, pi/4]
    z = r * r
    sin_r = ((_SIN_C0 * z + _SIN_C1) * z + _SIN_C2) * z * r + r
    cos_r = ((_COS_C0 * z + _COS_C1) * z + _COS_C2) * z * z - 0.5 * z + 1.0
    q = k.astype(jnp.int32) & 3                              # quadrant mod 4
    swap = (q & 1) == 1
    sin_v = jnp.where(swap, cos_r, sin_r)
    cos_v = jnp.where(swap, sin_r, cos_r)
    sin_f = jnp.where(q >= 2, -sin_v, sin_v)                 # q in {2, 3}
    cos_f = jnp.where((q == 1) | (q == 2), -cos_v, cos_v)    # q in {1, 2}
    return sin_f, cos_f


# ---------------------------------------------------------------------------
# Kernel
# ---------------------------------------------------------------------------
def _fourier_features_kernel(x_ref, w_ref, o_ref):
    # f = x @ (scale * w), accumulated in f32 on the MXU.  K (num_features)
    # is tiny so the matmul is a negligible fraction of time — left as-is.
    f = jnp.dot(x_ref[...], w_ref[...], preferred_element_type=jnp.float32)
    sin_f, cos_f = _sincos_shared(f)
    # Lane-offset-0 stores for both halves; (B,2,H)->(B,2H) merge done
    # (for free) in the wrapper.
    o_ref[:, 0, :] = cos_f.astype(o_ref.dtype)
    o_ref[:, 1, :] = sin_f.astype(o_ref.dtype)


# ---------------------------------------------------------------------------
# Tiling / wrapper
# ---------------------------------------------------------------------------
def _round_up(x, m):
    return ((x + m - 1) // m) * m


def _vmem_capacity_bytes():
    try:
        info = pltpu.get_tpu_info()
        cap = getattr(info, "vmem_capacity_bytes", None)
        if cap:
            return int(cap)
    except Exception:
        pass
    return 64 * 1024 * 1024  # conservative fallback (v7x per-TensorCore)


def _choose_block_rows(B, K, H, itemsize):
    """Batch tile derived from a VMEM budget (not a fixed constant)."""
    budget = _vmem_capacity_bytes() // 2          # headroom for compiler scratch
    h_pad = _round_up(H, 128)
    k_pad = _round_up(K, 128)
    # Per-row bytes: double-buffered x tile, double-buffered (2,H) output row
    # (padded to (8,128) sublane/lane tiles), plus f32 intermediates
    # (f, reduced arg, z, sin/cos, quadrant selects).
    per_row = (2 * k_pad * itemsize
               + 2 * 8 * h_pad * itemsize
               + 8 * h_pad * 4)
    tb = max(8, budget // per_row)
    tb = min(tb, 16384)                           # step overhead fully amortized
    if B >= 16:
        # Guarantee >= 2 grid steps so both v7x TensorCores get work.
        tb = min(tb, _round_up(-(-B // 2), 8))
    if tb >= B:
        return B
    return max(8, (tb // 8) * 8)


def fourier_features(x, weight, scale=2.0 * math.pi, block_rows=None):
    """x: (B, num_features), weight: (num_features, dim_out//2) -> (B, dim_out)."""
    if x.ndim != 2:
        raise ValueError("Expected input of (B x k) tensors.")
    if x.shape[1] != weight.shape[0]:
        raise ValueError(
            f"Expected input to have {weight.shape[0]} features to encode.")
    B, K = x.shape
    H = weight.shape[1]
    out_dtype = x.dtype

    # Fold the scalar scale into the resident weight once, kept in f32 so the
    # numerics match scaling the f32 product (no extra bf16/fp8 rounding).
    # TODO(synk): precompute this at module init instead of per call.
    w_scaled = weight.astype(jnp.float32) * jnp.float32(scale)

    itemsize = jnp.dtype(out_dtype).itemsize
    tb = block_rows if block_rows is not None else _choose_block_rows(B, K, H, itemsize)
    grid = ((B + tb - 1) // tb,)

    vmem_limit = int(0.75 * _vmem_capacity_bytes())

    cost = pl.CostEstimate(
        flops=2 * B * K * H,
        transcendentals=2 * B * H,
        bytes_accessed=itemsize * (B * K + B * 2 * H) + 4 * K * H,
    )

    out3 = pl.pallas_call(
        _fourier_features_kernel,
        out_shape=jax.ShapeDtypeStruct((B, 2, H), out_dtype),
        grid=grid,
        in_specs=[
            pl.BlockSpec((tb, K), lambda i: (i, 0)),   # x row tile
            pl.BlockSpec((K, H), lambda i: (0, 0)),    # weight resident across steps
        ],
        out_specs=pl.BlockSpec((tb, 2, H), lambda i: (i, 0, 0)),
        compiler_params=pltpu.CompilerParams(
            dimension_semantics=("parallel",),
            vmem_limit_bytes=vmem_limit,
        ),
        cost_estimate=cost,
    )(x, w_scaled)

    # Free row-major merge of trailing dims == torch.cat([cos, sin], dim=-1).
    return out3.reshape(B, 2 * H)


def fourier_features_ref(x, weight, scale=2.0 * math.pi):
    f = scale * (x.astype(jnp.float32) @ weight.astype(jnp.float32))
    return jnp.concatenate([jnp.cos(f), jnp.sin(f)], axis=-1).astype(x.dtype)


if __name__ == "__main__":
    # Module config (deterministic, synthetic "checkpoint").
    num_features = 4
    dim_out = 64
    std = 1.0
    scale = 2.0 * math.pi

    key = jax.random.PRNGKey(0)
    k_w, k_x1, k_x2 = jax.random.split(key, 3)

    # weight buffer: randn((num_features, dim_out // 2)) * std
    weight = jax.random.normal(k_w, (num_features, dim_out // 2), jnp.float32) * std

    # Single-block path (B fits one tile).
    B = 8
    x = jax.random.normal(k_x1, (B, num_features), jnp.float32)
    out = jax.block_until_ready(fourier_features(x, weight, scale))
    ref = fourier_features_ref(x, weight, scale)
    assert out.shape == (B, dim_out), out.shape
    assert jnp.allclose(out, ref, atol=2e-5, rtol=2e-5), "mismatch vs reference"

    # Multi-block path: B >= 16 forces >= 2 grid steps (v7x dual-TC sharding)
    # and exercises a partial trailing block.
    B2 = 40
    x2 = jax.random.normal(k_x2, (B2, num_features), jnp.float32)
    out2 = jax.block_until_ready(fourier_features(x2, weight, scale))
    ref2 = fourier_features_ref(x2, weight, scale)
    assert out2.shape == (B2, dim_out), out2.shape
    assert jnp.allclose(out2, ref2, atol=2e-5, rtol=2e-5), "mismatch vs reference (tiled)"

    print("KERNEL_OK")
</pallas_src>

<mosaic_0001>
module attributes {stable_mosaic.version = 11 : i64} {
  func.func @_fourier_features_kernel(%arg0: i32, %arg1: memref<8x4xf32, #tpu.memory_space<vmem>>, %arg2: memref<4x32xf32, #tpu.memory_space<vmem>>, %arg3: memref<8x2x32xf32, #tpu.memory_space<vmem>>) attributes {dimension_semantics = [#tpu.dimension_semantics<parallel>], iteration_bounds = array<i64: 1>, scalar_prefetch = 0 : i64, scratch_operands = 0 : i64, tpu.core_type = #tpu.core_type<tc>, window_params = [{transform_indices = @transform_0, window_bounds = array<i64: 8, 4>}, {pipeline_mode = #tpu.pipeline_mode<synchronous>, transform_indices = @transform_1, window_bounds = array<i64: 4, 32>}, {transform_indices = @transform_2, window_bounds = array<i64: 8, 2, 32>}]} {
    %c0 = arith.constant 0 : index
    %c0_0 = arith.constant 0 : index
    %0 = vector.load %arg1[%c0, %c0_0] : memref<8x4xf32, #tpu.memory_space<vmem>>, vector<8x4xf32>
    %c0_1 = arith.constant 0 : index
    %c0_2 = arith.constant 0 : index
    %1 = vector.load %arg2[%c0_1, %c0_2] : memref<4x32xf32, #tpu.memory_space<vmem>>, vector<4x32xf32>
    %cst = arith.constant dense<0.000000e+00> : vector<8x32xf32>
    %2 = tpu.matmul %0, %1, %cst {dimension_numbers = #tpu.dot_dimension_numbers<[1], [0], [0], [1], [0, 0, 1, 1], [], []>} : vector<8x4xf32>, vector<4x32xf32>, vector<8x32xf32> -> vector<8x32xf32>
    %cst_3 = arith.constant 0.636619746 : f32
    %3 = vector.broadcast %cst_3 : f32 to vector<8x32xf32>
    %4 = arith.mulf %2, %3 : vector<8x32xf32>
    %cst_4 = arith.constant 5.000000e-01 : f32
    %5 = vector.broadcast %cst_4 : f32 to vector<8x32xf32>
    %6 = arith.addf %4, %5 : vector<8x32xf32>
    %7 = math.floor %6 : vector<8x32xf32>
    %cst_5 = arith.constant 1.5703125 : f32
    %8 = vector.broadcast %cst_5 : f32 to vector<8x32xf32>
    %9 = arith.mulf %7, %8 : vector<8x32xf32>
    %10 = arith.subf %2, %9 : vector<8x32xf32>
    %cst_6 = arith.constant 4.83751297E-4 : f32
    %11 = vector.broadcast %cst_6 : f32 to vector<8x32xf32>
    %12 = arith.mulf %7, %11 : vector<8x32xf32>
    %13 = arith.subf %10, %12 : vector<8x32xf32>
    %cst_7 = arith.constant 7.549790e-08 : f32
    %14 = vector.broadcast %cst_7 : f32 to vector<8x32xf32>
    %15 = arith.mulf %7, %14 : vector<8x32xf32>
    %16 = arith.subf %13, %15 : vector<8x32xf32>
    %17 = arith.mulf %16, %16 : vector<8x32xf32>
    %cst_8 = arith.constant -1.95152956E-4 : f32
    %18 = vector.broadcast %cst_8 : f32 to vector<8x32xf32>
    %19 = arith.mulf %18, %17 : vector<8x32xf32>
    %cst_9 = arith.constant 0.00833216123 : f32
    %20 = vector.broadcast %cst_9 : f32 to vector<8x32xf32>
    %21 = arith.addf %19, %20 : vector<8x32xf32>
    %22 = arith.mulf %21, %17 : vector<8x32xf32>
    %cst_10 = arith.constant -0.166666552 : f32
    %23 = vector.broadcast %cst_10 : f32 to vector<8x32xf32>
    %24 = arith.addf %22, %23 : vector<8x32xf32>
    %25 = arith.mulf %24, %17 : vector<8x32xf32>
    %26 = arith.mulf %25, %16 : vector<8x32xf32>
    %27 = arith.addf %26, %16 : vector<8x32xf32>
    %cst_11 = arith.constant 2.44331568E-5 : f32
    %28 = vector.broadcast %cst_11 : f32 to vector<8x32xf32>
    %29 = arith.mulf %28, %17 : vector<8x32xf32>
    %cst_12 = arith.constant -0.00138873165 : f32
    %30 = vector.broadcast %cst_12 : f32 to vector<8x32xf32>
    %31 = arith.addf %29, %30 : vector<8x32xf32>
    %32 = arith.mulf %31, %17 : vector<8x32xf32>
    %cst_13 = arith.constant 0.0416666456 : f32
    %33 = vector.broadcast %cst_13 : f32 to vector<8x32xf32>
    %34 = arith.addf %32, %33 : vector<8x32xf32>
    %35 = arith.mulf %34, %17 : vector<8x32xf32>
    %36 = arith.mulf %35, %17 : vector<8x32xf32>
    %cst_14 = arith.constant 5.000000e-01 : f32
    %37 = vector.broadcast %cst_14 : f32 to vector<8x32xf32>
    %38 = arith.mulf %37, %17 : vector<8x32xf32>
    %39 = arith.subf %36, %38 : vector<8x32xf32>
    %cst_15 = arith.constant 1.000000e+00 : f32
    %40 = vector.broadcast %cst_15 : f32 to vector<8x32xf32>
    %41 = arith.addf %39, %40 : vector<8x32xf32>
    %42 = arith.fptosi %7 : vector<8x32xf32> to vector<8x32xi32>
    %c3_i32 = arith.constant 3 : i32
    %43 = vector.broadcast %c3_i32 : i32 to vector<8x32xi32>
    %44 = arith.andi %42, %43 : vector<8x32xi32>
    %c1_i32 = arith.constant 1 : i32
    %45 = vector.broadcast %c1_i32 : i32 to vector<8x32xi32>
    %46 = arith.andi %44, %45 : vector<8x32xi32>
    %c1_i32_16 = arith.constant 1 : i32
    %47 = vector.broadcast %c1_i32_16 : i32 to vector<8x32xi32>
    %48 = arith.cmpi eq, %46, %47 : vector<8x32xi32>
    %49 = arith.select %48, %41, %27 : vector<8x32xi1>, vector<8x32xf32>
    %50 = arith.select %48, %27, %41 : vector<8x32xi1>, vector<8x32xf32>
    %c2_i32 = arith.constant 2 : i32
    %51 = vector.broadcast %c2_i32 : i32 to vector<8x32xi32>
    %52 = arith.cmpi sge, %44, %51 : vector<8x32xi32>
    %cst_17 = arith.constant 0.000000e+00 : f32
    %53 = vector.broadcast %cst_17 : f32 to vector<8x32xf32>
    %54 = arith.subf %53, %49 : vector<8x32xf32>
    %55 = arith.select %52, %54, %49 : vector<8x32xi1>, vector<8x32xf32>
    %c1_i32_18 = arith.constant 1 : i32
    %56 = vector.broadcast %c1_i32_18 : i32 to vector<8x32xi32>
    %57 = arith.cmpi eq, %44, %56 : vector<8x32xi32>
    %c2_i32_19 = arith.constant 2 : i32
    %58 = vector.broadcast %c2_i32_19 : i32 to vector<8x32xi32>
    %59 = arith.cmpi eq, %44, %58 : vector<8x32xi32>
    %60 = arith.ori %57, %59 : vector<8x32xi1>
    %cst_20 = arith.constant 0.000000e+00 : f32
    %61 = vector.broadcast %cst_20 : f32 to vector<8x32xf32>
    %62 = arith.subf %61, %50 : vector<8x32xf32>
    %63 = arith.select %60, %62, %50 : vector<8x32xi1>, vector<8x32xf32>
    %c0_21 = arith.constant 0 : index
    %c0_22 = arith.constant 0 : index
    %c0_23 = arith.constant 0 : index
    %64 = vector.load %arg3[%c0_21, %c0_22, %c0_23] : memref<8x2x32xf32, #tpu.memory_space<vmem>>, vector<8x1x32xf32>
    %65 = vector.shape_cast %64 : vector<8x1x32xf32> to vector<8x32xf32>
    %66 = vector.shape_cast %63 : vector<8x32xf32> to vector<8x1x32xf32>
    tpu.vector_store %arg3[%c0_21, %c0_22, %c0_23], %66 {strides = array<i32>} : memref<8x2x32xf32, #tpu.memory_space<vmem>>, vector<8x1x32xf32>,
    %c0_24 = arith.constant 0 : index
    %c1 = arith.constant 1 : index
    %c0_25 = arith.constant 0 : index
    %67 = vector.load %arg3[%c0_24, %c1, %c0_25] : memref<8x2x32xf32, #tpu.memory_space<vmem>>, vector<8x1x32xf32>
    %68 = vector.shape_cast %67 : vector<8x1x32xf32> to vector<8x32xf32>
    %69 = vector.shape_cast %55 : vector<8x32xf32> to vector<8x1x32xf32>
    tpu.vector_store %arg3[%c0_24, %c1, %c0_25], %69 {strides = array<i32>} : memref<8x2x32xf32, #tpu.memory_space<vmem>>, vector<8x1x32xf32>,
    return
  }
  func.func @transform_0(%arg0: i32) -> (i32, i32) {
    %c0_i32 = arith.constant 0 : i32
    %c0_i32_0 = arith.constant 0 : i32
    return %arg0, %c0_i32 : i32, i32
  }
  func.func @transform_1(%arg0: i32) -> (i32, i32) {
    %c0_i32 = arith.constant 0 : i32
    %c0_i32_0 = arith.constant 0 : i32
    %c0_i32_1 = arith.constant 0 : i32
    return %c0_i32, %c0_i32_0 : i32, i32
  }
  func.func @transform_2(%arg0: i32) -> (i32, i32, i32) {
    %c0_i32 = arith.constant 0 : i32
    %c0_i32_0 = arith.constant 0 : i32
    %c0_i32_1 = arith.constant 0 : i32
    return %arg0, %c0_i32, %c0_i32_0 : i32, i32, i32
  }
}

</mosaic_0001>

<bundles_post_ra>
// kernel: tpu_custom_call.1
= control target key start
LH: loop header
LB: loop body
LE: loop exit
PB: predicated region body
PF: predicated region fallthrough
CT: control target
= control target key end

     0   :  { %vm18_vm0 = vcmask 1043456   ;;  %v320_v2 = vmov 0.0   ;;  %vm321_vm1 = vmmov 0   ;;  %vm14_vm2 = vcmask 31744   ;;  %s366_s0 = inlined_call_operand.vmem [shape: f32[8,4], index: 0, kind: input, shape index: {}]   ;;  %s367_s1 = inlined_call_operand.vmem [shape: f32[4,32], index: 1, kind: input, shape index: {}]   ;;  %s368_s2 = inlined_call_operand.hbm [shape: f32[8,2,32], index: 2, kind: output, shape index: {}]  }
   0x1   :  { %v13_v0 = vld [vmem:[%s367_s1] sm:$0xf]  ;;  %285 = vmatprep.subr.mxu0 %v320_v2  ;;  %287 = vmatprep.mubr.msk.f32.mxu0 %vm321_vm1, %v320_v2 }
   0x2   :  { %v12_v1 = vld [vmem:[%s366_s0] sm:$0xff] }
   0x3   :  { %7 = vsyncpa [#allocation3], 0  ;;  %286 = vmatpush3.msk.msra.mxu0 %vm18_vm0, %v13_v0  ;;  %v322_v28 = vmov 1966171168   ;;  %v137_v30 = vlaneseq  ;;  %vm190_vm8 = vcmask 253952   ;;  %s323_s0 = smov [#allocation2]  }
   0x4   :  { %288 = vmatmul.mubr.msk.f32.vlgmr.msra.gmra.mxu0 %vm14_vm2, %v12_v1  ;;  %v135_v29 = vunpack.c.l.s4 %v322_v28  ;;  %s270_s1 = sshll.u32 %s323_s0, 4  ;;  %s271_s1 = int_to_ptr.vmem [resolvable:$true] %s270_s1 }
   0x5   :  { %v138_v37 = vshrl.u32 %v137_v30, 7  ;;  %s298_s13 = scalar_lea.vmem %s271_s1, 256  ;;  %p303_p1 = scmp.lt.s32.totalorder %s271_s1, %s271_s1 }
   0x6   :  { %v136_v36 = vunpack.c.0.s8 %v135_v29  ;;  %p299_p0 = scmp.ne.s32.totalorder %s271_s1, %s298_s13  ;;  %p304_p2 = scmp.lt.s32.totalorder %s298_s13, %s298_s13 }
   0x8   :  { %v139_v42 = vsub.s32 %v136_v36, %v138_v37  ;;  %p305_p3 = por %p304_p2, %p303_p1 }
   0xa   :  { %p306_p4 = pnand %p305_p3, %p299_p0 }
  0xc4   :  { %v88_v3 = vpop.f32.mrf.mxu0 }
  0xc5   :  { %v92_v4 = vmul.f32 0.63661975, %v88_v3 }
  0xc6   :  { %v289_v5 = vpop.f32.mrf.mxu0 }
  0xc7   :  { %v93_v6 = vadd.f32 0.5, %v92_v4 }
  0xc9   :  { %v94_v7 = vfloor.f32 %v93_v6 }
  0xcb   :  { %v95_v8 = vmul.f32 1.5703125, %v94_v7  ;;  %v97_v10 = vmul.f32 0.0004837513, %v94_v7  ;;  %v99_v12 = vmul.f32 7.54979e-08, %v94_v7  ;;  %v290_v15 = vtrunc.f32 %v94_v7 }
  0xcd   :  { %v96_v9 = vsub.f32 %v88_v3, %v95_v8  ;;  %v291_v20 = vcvt.f32.s32 %v290_v15 }
  0xcf   :  { %v98_v11 = vsub.f32 %v96_v9, %v97_v10  ;;  %v119_v25 = vand.u32 3, %v291_v20 }
  0xd1   :  { %v100_v13 = vsub.f32 %v98_v11, %v99_v12  ;;  %v120_v34 = vand.u32 1, %v119_v25  ;;  %vm127_vm4 = vcmp.eq.s32.totalorder %v119_v25, 1  ;;  %vm128_vm5 = vcmp.eq.s32.totalorder %v119_v25, 2 }
  0xd2   :  { %vm124_vm6 = vcmp.ge.s32.totalorder %v119_v25, 2  ;;  %vm129_vm7 = vmor %vm127_vm4, %vm128_vm5 }
  0xd3   :  { %v101_v14 = vmul.f32 %v100_v13, %v100_v13  ;;  %vm121_vm3 = vcmp.eq.s32.totalorder %v120_v34, 1 }
  0xd5   :  { %v102_v16 = vmul.f32 -0.00019515296, %v101_v14  ;;  %v109_v17 = vmul.f32 2.4433157e-05, %v101_v14  ;;  %v115_v33 = vmul.f32 0.5, %v101_v14 }
  0xd7   :  { %v103_v18 = vadd.f32 0.008332161, %v102_v16  ;;  %v110_v19 = vadd.f32 -0.0013887316, %v109_v17 }
  0xd9   :  { %v104_v21 = vmul.f32 %v103_v18, %v101_v14  ;;  %v111_v22 = vmul.f32 %v110_v19, %v101_v14 }
  0xdb   :  { %v105_v23 = vadd.f32 -0.16666655, %v104_v21  ;;  %v112_v24 = vadd.f32 0.041666646, %v111_v22 }
  0xdd   :  { %v106_v26 = vmul.f32 %v105_v23, %v101_v14  ;;  %v113_v27 = vmul.f32 %v112_v24, %v101_v14 }
  0xdf   :  { %v107_v31 = vmul.f32 %v106_v26, %v100_v13  ;;  %v114_v32 = vmul.f32 %v113_v27, %v101_v14 }
  0xe1   :  { %v116_v35 = vsub.f32 %v114_v32, %v115_v33  ;;  %v108_v38 = vadd.f32 %v107_v31, %v100_v13 }
  0xe3   :  { %v117_v39 = vadd.f32 1.0, %v116_v35 }
  0xe5   :  { %v122_v40 = vsel %vm121_vm3, %v117_v39, %v108_v38  ;;  %v123_v41 = vsel %vm121_vm3, %v108_v38, %v117_v39 }
  0xe6   :  { %v125_v43 = vsub.f32 0.0, %v122_v40  ;;  %v130_v44 = vsub.f32 0.0, %v123_v41 }
  0xe8   :  { %v126_v45 = vsel %vm124_vm6, %v125_v43, %v122_v40  ;;  %v131_v46 = vsel %vm129_vm7, %v130_v44, %v123_v41 }
  0xe9   :  { %v133_v47 = vcombine.high %v131_v46, %v131_v46  ;;  %v140_v48 = vrot.slane %v131_v46, %v139_v42  ;;  %v200_v49 = vcombine.high %v126_v45, %v126_v45  ;;  %v207_v50 = vrot.slane %v126_v45, %v139_v42 }
  0xeb   :  { %v147_v51 = vrot.slane %v133_v47, %v139_v42  ;;  %v148_v52 = vcombine.high %v140_v48, %v140_v48  ;;  %v156_v53 = vrot.slane %v140_v48, %v139_v42  ;;  %v214_v54 = vrot.slane %v200_v49, %v139_v42 }
  0xec   :  { %v215_v55 = vcombine.high %v207_v50, %v207_v50  ;;  %v223_v56 = vrot.slane %v207_v50, %v139_v42 }
  0xed   :  { %v149_v57 = vcombine.high %v147_v51, %v147_v51  ;;  %v163_v58 = vrot.slane %v147_v51, %v139_v42  ;;  %v170_v59 = vrot.slane %v148_v52, %v139_v42  ;;  %v178_v60 = vcombine.high %v156_v53, %v156_v53  ;;  %191 = vst.msk [vmem:[#allocation2] sm:$0x1] %vm190_vm8, %v156_v53 }
  0xee   :  { %v216_v61 = vcombine.high %v214_v54, %v214_v54  ;;  %v230_v62 = vrot.slane %v214_v54, %v139_v42  ;;  %v237_v63 = vrot.slane %v215_v55, %v139_v42  ;;  %v245_v0 = vcombine.high %v223_v56, %v223_v56  ;;  %257 = vst.msk [vmem:[#allocation2 + $0x1] sm:$0x1] %vm190_vm8, %v223_v56 }
  0xef   :  { %v177_v1 = vrot.slane %v149_v57, %v139_v42  ;;  %v179_v2 = vcombine.high %v163_v58, %v163_v58  ;;  %v180_v3 = vcombine.high %v170_v59, %v170_v59  ;;  %192 = vst.msk [vmem:[#allocation2 + $0x2] sm:$0x1] %vm190_vm8, %v170_v59  ;;  %193 = vst.msk [vmem:[#allocation2 + $0x4] sm:$0x1] %vm190_vm8, %v178_v60 }
  0xf0   :  { %195 = vst.msk [vmem:[#allocation2 + $0x8] sm:$0x1] %vm190_vm8, %v163_v58  ;;  %v244_v4 = vrot.slane %v216_v61, %v139_v42  ;;  %v246_v5 = vcombine.high %v230_v62, %v230_v62  ;;  %v247_v6 = vcombine.high %v237_v63, %v237_v63  ;;  %258 = vst.msk [vmem:[#allocation2 + $0x3] sm:$0x1] %vm190_vm8, %v237_v63 }
  0xf1   :  { %259 = vst.msk [vmem:[#allocation2 + $0x5] sm:$0x1] %vm190_vm8, %v245_v0  ;;  %261 = vst.msk [vmem:[#allocation2 + $0x9] sm:$0x1] %vm190_vm8, %v230_v62  ;;  %v181_v7 = vcombine.high %v177_v1, %v177_v1 }
  0xf2   :  { %194 = vst.msk [vmem:[#allocation2 + $0x6] sm:$0x1] %vm190_vm8, %v180_v3  ;;  %196 = vst.msk [vmem:[#allocation2 + $0xa] sm:$0x1] %vm190_vm8, %v177_v1  ;;  %v248_v8 = vcombine.high %v244_v4, %v244_v4 }
  0xf3   :  { %197 = vst.msk [vmem:[#allocation2 + $0xc] sm:$0x1] %vm190_vm8, %v179_v2  ;;  %260 = vst.msk [vmem:[#allocation2 + $0x7] sm:$0x1] %vm190_vm8, %v247_v6 }
  0xf4   :  { %262 = vst.msk [vmem:[#allocation2 + $0xb] sm:$0x1] %vm190_vm8, %v244_v4  ;;  %263 = vst.msk [vmem:[#allocation2 + $0xd] sm:$0x1] %vm190_vm8, %v246_v5 }
  0xf5   :  { %198 = vst.msk [vmem:[#allocation2 + $0xe] sm:$0x1] %vm190_vm8, %v181_v7  ;;  %264 = vst.msk [vmem:[#allocation2 + $0xf] sm:$0x1] %vm190_vm8, %v248_v8 }
  0xf6   :  { %309 = shalt.err (!%p306_p4)
}
  0xf7   :  { %s324_s14 = smov 32   ;;  %s325_s15 = smov 2  }
  0xf8   :  { %276 = dma.vmem_to_hbm [thread:$0]  %s271_s1, 256, %s368_s2, [#allocation3], %s324_s14, %s324_s14, %s325_s15  }
  0xf9   :  { %318 = dma.done.wait [#allocation3], 256  }
  0xfa   :  { %319 = vsyncadd [#allocation3], 4294967040 }
  0xfb   :  { %280 = vsyncpa [#allocation3], 1 }

</bundles_post_ra>
